<compile_context>
chip_gen: v7x
topology: tpu7x:2x2x1
jax: 0.10.0
libtpu: 0.0.40
codegen_flags: <defaults>
</compile_context>

<pallas_src>
import functools

import jax
import jax.numpy as jnp
from jax import lax
from jax.experimental import pallas as pl
from jax.experimental.pallas import tpu as pltpu


def _round_up(x, m):
    return ((x + m - 1) // m) * m


def _vmem_capacity_bytes():
    """Physical per-core VMEM; conservative fallback = v7x (64 MiB)."""
    try:
        info = pltpu.get_tpu_info()
        cap = getattr(info, "vmem_capacity_bytes", None)
        if cap:
            return int(cap)
    except Exception:
        pass
    return 64 * 1024 * 1024


# ---------------------------------------------------------------------------
# Path A: VMEM-resident table, one-hot MXU gather (small vocabularies).
# ---------------------------------------------------------------------------
def _embed_onehot_kernel(ids_ref, table_ref, out_ref):
    # ids_ref:   VMEM (TILE, 1) int32 — token ids for this tile
    # table_ref: VMEM (V, D)          — full table, resident (single copy)
    # out_ref:   VMEM (TILE, D)
    tile = out_ref.shape[0]
    vocab = table_ref.shape[0]
    ids = ids_ref[...]                                            # (TILE, 1)
    vocab_iota = lax.broadcasted_iota(jnp.int32, (tile, vocab), 1)
    # One-hot in the table's dtype -> gather is exact (0/1 weights, f32 acc).
    one_hot = (ids == vocab_iota).astype(table_ref.dtype)         # (TILE, V)
    out_ref[...] = jnp.dot(
        one_hot, table_ref[...], preferred_element_type=jnp.float32
    ).astype(out_ref.dtype)


def _embed_resident(flat_ids, table, tile):
    n_pad = flat_ids.shape[0]
    v, d = table.shape
    itemsize = jnp.dtype(table.dtype).itemsize

    # Explicit VMEM limit: single-buffered table (2x safety margin) +
    # double-buffered (TILE, D) output + (TILE, 1) id blocks + slack.
    sub = {4: 8, 2: 16, 1: 32}.get(itemsize, 8)
    table_vmem = _round_up(v, sub) * _round_up(d, 128) * itemsize
    out_block = tile * _round_up(d, 128) * itemsize
    ids_block = tile * 128 * 4
    vmem_limit = int(2 * table_vmem + 2 * out_block + 2 * ids_block + (4 << 20))

    return pl.pallas_call(
        _embed_onehot_kernel,
        out_shape=jax.ShapeDtypeStruct((n_pad, d), table.dtype),
        grid_spec=pl.GridSpec(
            grid=(n_pad // tile,),
            in_specs=[
                # ids: (TILE, 1) block per step
                pl.BlockSpec((tile, 1), lambda i: (i, 0)),
                # table: whole array placed in VMEM once (no pipelining,
                # no double-buffering) — halves the table footprint vs a
                # constant-index_map blocked spec.
                pl.BlockSpec(memory_space=pltpu.MemorySpace.VMEM),
            ],
            out_specs=pl.BlockSpec((tile, d), lambda i: (i, 0)),
        ),
        compiler_params=pltpu.CompilerParams(
            dimension_semantics=("parallel",),
            vmem_limit_bytes=vmem_limit,
        ),
    )(flat_ids.reshape(n_pad, 1), table)


# ---------------------------------------------------------------------------
# Path B: table stays in HBM; batched manual DMA row gather -> output block.
# ---------------------------------------------------------------------------
def _embed_dma_kernel(ids_ref, table_hbm, out_ref, sem, *, tile):
    # ids_ref:   SMEM (N_chunk,) int32 scalar-prefetch
    # table_hbm: HBM  (V, D)     raw ref (memory_space=pl.ANY)
    # out_ref:   VMEM (TILE, D)  — DMA destination (no staging copy)
    # sem:       single DMA semaphore, reused by all TILE row copies
    base = pl.program_id(0) * tile

    @pl.loop(0, tile)
    def _issue(t):
        row = ids_ref[base + t]
        pltpu.make_async_copy(
            table_hbm.at[pl.ds(row, 1), :],
            out_ref.at[pl.ds(t, 1), :],
            sem.at[0],
        ).start()

    # Wait with descriptors identical to the issued ones (same src row, same
    # dst slice); all copies have equal byte counts so a single shared
    # semaphore is sufficient regardless of completion order.
    @pl.loop(0, tile)
    def _wait(t):
        row = ids_ref[base + t]
        pltpu.make_async_copy(
            table_hbm.at[pl.ds(row, 1), :],
            out_ref.at[pl.ds(t, 1), :],
            sem.at[0],
        ).wait()


def _embed_dma_gather(flat_ids, table, tile):
    n_pad = flat_ids.shape[0]
    _, d = table.shape
    kernel = functools.partial(_embed_dma_kernel, tile=tile)
    return pl.pallas_call(
        kernel,
        out_shape=jax.ShapeDtypeStruct((n_pad, d), table.dtype),
        grid_spec=pltpu.PrefetchScalarGridSpec(
            num_scalar_prefetch=1,
            grid=(n_pad // tile,),
            in_specs=[pl.BlockSpec(memory_space=pl.ANY)],   # table: raw HBM ref
            out_specs=pl.BlockSpec((tile, d), lambda i, ids: (i, 0)),
            scratch_shapes=[pltpu.SemaphoreType.DMA((1,))],
        ),
        compiler_params=pltpu.CompilerParams(
            dimension_semantics=("parallel",),
        ),
    )(flat_ids, table)


def _embed_dma_gather_chunked(flat_ids, table, tile, max_tokens_per_call):
    """Bound the scalar-prefetched id array in SMEM by chunking the call."""
    n_pad = flat_ids.shape[0]
    chunk = max(tile, (max_tokens_per_call // tile) * tile)
    if n_pad <= chunk:
        return _embed_dma_gather(flat_ids, table, tile)
    parts = [
        _embed_dma_gather(flat_ids[s:s + chunk], table, tile)
        for s in range(0, n_pad, chunk)
    ]
    return jnp.concatenate(parts, axis=0)


# ---------------------------------------------------------------------------
# Wrapper: Embedder.forward(x) == embedder(x, text_embedding_vectors)
# ---------------------------------------------------------------------------
def embedder(ids, emb_table, *, force_dma=False,
             vmem_table_budget_bytes=None, max_resident_vocab=4096):
    """ids: (B, S) int; emb_table: (V, D) -> (B, S, D) in emb_table.dtype."""
    B, S = ids.shape
    V, D = emb_table.shape

    flat = ids.reshape(-1).astype(jnp.int32)
    flat = jnp.clip(flat, 0, V - 1)          # guard against OOB gather DMAs
    N = flat.shape[0]

    itemsize = jnp.dtype(emb_table.dtype).itemsize
    table_bytes = V * D * itemsize

    # Generation-aware resident budget: a fraction of physical per-core VMEM
    # (64 MiB v7x, 128 MiB v5e/v6e), so the single-buffered table + tiles
    # always fit once vmem_limit_bytes is raised.
    if vmem_table_budget_bytes is None:
        vmem_table_budget_bytes = _vmem_capacity_bytes() // 5

    # Gate path A on vocabulary size too: the (TILE, V) one-hot build is
    # O(TILE*V) VPU work and becomes the critical path for large V.
    use_resident = (
        (not force_dma)
        and V <= max_resident_vocab
        and table_bytes <= vmem_table_budget_bytes
    )

    # Tokens per grid step. Resident path: 256 fills the 256-wide MXU on
    # v6e/v7x and halves step overhead. DMA path: 128 row-gather DMAs in
    # flight per step on one reused semaphore.
    tile = 256 if use_resident else 128

    n_pad = _round_up(N, tile)
    flat = jnp.pad(flat, (0, n_pad - N))     # pad with id 0 (valid row)

    if use_resident:
        out = _embed_resident(flat, emb_table, tile)
    else:
        out = _embed_dma_gather_chunked(flat, emb_table, tile,
                                        max_tokens_per_call=64 * 1024)

    return out[:N].reshape(B, S, D)


if __name__ == "__main__":
    key = jax.random.PRNGKey(0)
    k_tab, k_ids = jax.random.split(key)

    VOCAB, DIM = 64, 128   # text_embedding_vectors shape (V, D)
    B, S = 2, 8

    # Deterministic "pretrained" embedding table (frozen in the PyTorch module).
    emb_table = jax.random.normal(k_tab, (VOCAB, DIM), dtype=jnp.float32)
    ids = jax.random.randint(k_ids, (B, S), 0, VOCAB, dtype=jnp.int32)

    # Reference: plain-JAX gather (== torch nn.Embedding lookup).
    ref = jnp.take(emb_table, ids, axis=0)

    # Path A: VMEM-resident table + one-hot MXU gather (chosen automatically
    # for this small table).
    out_a = jax.block_until_ready(embedder(ids, emb_table))
    assert out_a.shape == (B, S, DIM)
    assert jnp.allclose(out_a, ref), "resident-table path mismatch vs reference"

    # Path B: HBM table + batched manual DMA gather (forced here to verify the
    # large-vocabulary fallback as well).
    out_b = jax.block_until_ready(embedder(ids, emb_table, force_dma=True))
    assert out_b.shape == (B, S, DIM)
    assert jnp.allclose(out_b, ref), "DMA-gather path mismatch vs reference"

    print("KERNEL_OK")
</pallas_src>

<mosaic_0001>
module attributes {stable_mosaic.version = 11 : i64} {
  func.func @_embed_onehot_kernel(%arg0: i32, %arg1: memref<256x1xi32, #tpu.memory_space<vmem>>, %arg2: memref<64x128xf32, #tpu.memory_space<vmem>>, %arg3: memref<256x128xf32, #tpu.memory_space<vmem>>) attributes {dimension_semantics = [#tpu.dimension_semantics<parallel>], iteration_bounds = array<i64: 1>, scalar_prefetch = 0 : i64, scratch_operands = 0 : i64, tpu.core_type = #tpu.core_type<tc>, window_params = [{transform_indices = @transform_0, window_bounds = array<i64: 256, 1>}, {pipeline_mode = #tpu.pipeline_mode<synchronous>, transform_indices = @transform_1, window_bounds = array<i64: 64, 128>}, {transform_indices = @transform_2, window_bounds = array<i64: 256, 128>}]} {
    %c0 = arith.constant 0 : index
    %c0_0 = arith.constant 0 : index
    %0 = vector.load %arg1[%c0, %c0_0] : memref<256x1xi32, #tpu.memory_space<vmem>>, vector<256x1xi32>
    %1 = tpu.iota {dimensions = array<i32: 1>} : vector<256x64xi32>
    %2 = vector.broadcast %0 : vector<256x1xi32> to vector<256x64xi32>
    %3 = arith.cmpi eq, %2, %1 : vector<256x64xi32>
    %4 = arith.extui %3 : vector<256x64xi1> to vector<256x64xi32>
    %5 = arith.sitofp %4 : vector<256x64xi32> to vector<256x64xf32>
    %c0_1 = arith.constant 0 : index
    %c0_2 = arith.constant 0 : index
    %6 = vector.load %arg2[%c0_1, %c0_2] : memref<64x128xf32, #tpu.memory_space<vmem>>, vector<64x128xf32>
    %cst = arith.constant dense<0.000000e+00> : vector<256x128xf32>
    %7 = tpu.matmul %5, %6, %cst {dimension_numbers = #tpu.dot_dimension_numbers<[1], [0], [0], [1], [0, 0, 1, 1], [], []>} : vector<256x64xf32>, vector<64x128xf32>, vector<256x128xf32> -> vector<256x128xf32>
    %c0_3 = arith.constant 0 : index
    %c0_4 = arith.constant 0 : index
    %8 = vector.load %arg3[%c0_3, %c0_4] : memref<256x128xf32, #tpu.memory_space<vmem>>, vector<256x128xf32>
    tpu.vector_store %arg3[%c0_3, %c0_4], %7 {strides = array<i32>} : memref<256x128xf32, #tpu.memory_space<vmem>>, vector<256x128xf32>,
    return
  }
  func.func @transform_0(%arg0: i32) -> (i32, i32) {
    %c0_i32 = arith.constant 0 : i32
    %c0_i32_0 = arith.constant 0 : i32
    return %arg0, %c0_i32 : i32, i32
  }
  func.func @transform_1(%arg0: i32) -> (i32, i32) {
    %c0_i32 = arith.constant 0 : i32
    %c0_i32_0 = arith.constant 0 : i32
    %c0_i32_1 = arith.constant 0 : i32
    return %c0_i32, %c0_i32_0 : i32, i32
  }
  func.func @transform_2(%arg0: i32) -> (i32, i32) {
    %c0_i32 = arith.constant 0 : i32
    %c0_i32_0 = arith.constant 0 : i32
    return %arg0, %c0_i32 : i32, i32
  }
}

</mosaic_0001>

<bundles_post_ra>
// kernel: tpu_custom_call.1
= control target key start
LH: loop header
LB: loop body
LE: loop exit
PB: predicated region body
PF: predicated region fallthrough
CT: control target
= control target key end

     0   :  { %v839_v2 = vmov 0   ;;  %s1089_s0 = inlined_call_operand.vmem [shape: s32[256,1], index: 0, kind: input, shape index: {}]   ;;  %s1090_s1 = inlined_call_operand.vmem [shape: f32[64,128], index: 1, kind: input, shape index: {}]   ;;  %s1091_s2 = inlined_call_operand.hbm [shape: f32[256,128], index: 2, kind: output, shape index: {}]  }
   0x1   :  { %v13_v0 = vld [vmem:[%s1089_s0 + $0x8] sm:$0xff]  ;;  %v12_v1 = vld [vmem:[%s1089_s0] sm:$0xff]  ;;  %814 = vset.pattern.permute.xlu1 %v839_v2  ;;  %813 = vset.pattern.permute.xlu0 %v839_v2  ;;  %v30_v5 = vld [vmem:[%s1089_s0 + $0x90] sm:$0xff] }
   0x2   :  { %50 = vperm.xlu1 %814, %v13_v0   ;;  %47 = vperm.xlu0 %813, %v12_v1   ;;  %v29_v3 = vld [vmem:[%s1089_s0 + $0x88] sm:$0xff]  ;;  %v28_v4 = vld [vmem:[%s1089_s0 + $0x80] sm:$0xff]  ;;  %v14_v6 = vld [vmem:[%s1089_s0 + $0x10] sm:$0xff] }
   0x3   :  { %v31_v7 = vld [vmem:[%s1089_s0 + $0x98] sm:$0xff]  ;;  %v238_v9 = vld [vmem:[%s1090_s1] sm:$0xff]  ;;  %v239_v10 = vld [vmem:[%s1090_s1 + $0x8] sm:$0xff] }
   0x4   :  { %v15_v8 = vld [vmem:[%s1089_s0 + $0x18] sm:$0xff]  ;;  %v240_v11 = vld [vmem:[%s1090_s1 + $0x10] sm:$0xff]  ;;  %v784_v13 = vpack.c.bf16 %v239_v10, %v238_v9 }
   0x5   :  { %v241_v12 = vld [vmem:[%s1090_s1 + $0x18] sm:$0xff] }
   0x6   :  { %98 = vperm.xlu1 %814, %v29_v3   ;;  %95 = vperm.xlu0 %813, %v28_v4   ;;  %v788_v14 = vpack.c.bf16 %v241_v12, %v240_v11 }
   0xa   :  { %101 = vperm.xlu1 %814, %v30_v5   ;;  %53 = vperm.xlu0 %813, %v14_v6  }
   0xb   :  { %7 = vsyncpa [#allocation3], 0  ;;  %v242_v15 = vld [vmem:[%s1090_s1 + $0x20] sm:$0xff]  ;;  %v243_v16 = vld [vmem:[%s1090_s1 + $0x28] sm:$0xff]  ;;  %785 = vmatprep.subr.bf16.mxu0 %v784_v13  ;;  %800 = vmatprep.subr.bf16.mxu1 %v784_v13  ;;  %v44_v45 = vlaneseq  ;;  %vm246_vm0 = vcmask 523264   ;;  %v840_v49 = vmov 0.0  }
   0xc   :  { %v32_v17 = vld [vmem:[%s1089_s0 + $0xa0] sm:$0xff]  ;;  %787 = vmatpush3.bf16.msra.mxu0 %v784_v13  ;;  %804 = vmatpush3.bf16.msra.mxu1 %v784_v13  ;;  %v792_v19 = vpack.c.bf16 %v243_v16, %v242_v15  ;;  %v244_v20 = vld [vmem:[%s1090_s1 + $0x30] sm:$0xff]  ;;  %v245_v21 = vld [vmem:[%s1090_s1 + $0x38] sm:$0xff] }
   0xd   :  { %v16_v18 = vld [vmem:[%s1089_s0 + $0x20] sm:$0xff]  ;;  %789 = vmatprep.subr.bf16.mxu0 %v788_v14  ;;  %801 = vmatprep.subr.bf16.mxu1 %v788_v14  ;;  %v33_v22 = vld [vmem:[%s1089_s0 + $0xa8] sm:$0xff]  ;;  %v796_v24 = vpack.c.bf16 %v245_v21, %v244_v20  ;;  %v34_v25 = vld [vmem:[%s1089_s0 + $0xb0] sm:$0xff]  ;;  %v979_v46 = vand.u32 127, %v44_v45 }
   0xe   :  { %104 = vperm.xlu1 %814, %v31_v7   ;;  %56 = vperm.xlu0 %813, %v15_v8   ;;  %v17_v23 = vld [vmem:[%s1089_s0 + $0x28] sm:$0xff]  ;;  %v18_v26 = vld [vmem:[%s1089_s0 + $0x30] sm:$0xff]  ;;  %v35_v27 = vld [vmem:[%s1089_s0 + $0xb8] sm:$0xff] }
   0xf   :  { %v19_v28 = vld [vmem:[%s1089_s0 + $0x38] sm:$0xff]  ;;  %v36_v29 = vld [vmem:[%s1089_s0 + $0xc0] sm:$0xff]  ;;  %v37_v31 = vld [vmem:[%s1089_s0 + $0xc8] sm:$0xff] }
  0x10   :  { %791 = vmatpush3.bf16.msra.mxu0 %v788_v14  ;;  %805 = vmatpush3.bf16.msra.mxu1 %v788_v14  ;;  %v20_v30 = vld [vmem:[%s1089_s0 + $0x40] sm:$0xff]  ;;  %v21_v32 = vld [vmem:[%s1089_s0 + $0x48] sm:$0xff]  ;;  %v38_v33 = vld [vmem:[%s1089_s0 + $0xd0] sm:$0xff] }
  0x11   :  { %793 = vmatprep.subr.bf16.mxu0 %v792_v19  ;;  %802 = vmatprep.subr.bf16.mxu1 %v792_v19  ;;  %v22_v34 = vld [vmem:[%s1089_s0 + $0x50] sm:$0xff]  ;;  %v39_v35 = vld [vmem:[%s1089_s0 + $0xd8] sm:$0xff]  ;;  %v40_v37 = vld [vmem:[%s1089_s0 + $0xe0] sm:$0xff] }
  0x12   :  { %107 = vperm.xlu1 %814, %v32_v17   ;;  %59 = vperm.xlu0 %813, %v16_v18   ;;  %v23_v36 = vld [vmem:[%s1089_s0 + $0x58] sm:$0xff]  ;;  %v24_v38 = vld [vmem:[%s1089_s0 + $0x60] sm:$0xff]  ;;  %v41_v39 = vld [vmem:[%s1089_s0 + $0xe8] sm:$0xff] }
  0x13   :  { %v25_v40 = vld [vmem:[%s1089_s0 + $0x68] sm:$0xff]  ;;  %v42_v41 = vld [vmem:[%s1089_s0 + $0xf0] sm:$0xff]  ;;  %v43_v43 = vld [vmem:[%s1089_s0 + $0xf8] sm:$0xff] }
  0x14   :  { %795 = vmatpush3.bf16.msra.mxu0 %v792_v19  ;;  %806 = vmatpush3.bf16.msra.mxu1 %v792_v19  ;;  %v26_v42 = vld [vmem:[%s1089_s0 + $0x70] sm:$0xff]  ;;  %v27_v44 = vld [vmem:[%s1089_s0 + $0x78] sm:$0xff]  ;;  %s841_s0 = smov [#allocation2]  }
  0x15   :  { %797 = vmatprep.subr.bf16.mxu0 %v796_v24  ;;  %803 = vmatprep.subr.bf16.mxu1 %v796_v24  ;;  %s605_s3 = sshll.u32 %s841_s0, 4  ;;  %s606_s3 = int_to_ptr.vmem [resolvable:$true] %s605_s3 }
  0x16   :  { %110 = vperm.xlu1 %814, %v33_v22   ;;  %62 = vperm.xlu0 %813, %v17_v23   ;;  %s815_s4 = scalar_lea.vmem %s606_s3, 4096  ;;  %p820_p1 = scmp.lt.s32.totalorder %s606_s3, %s606_s3 }
  0x17   :  { %p816_p0 = scmp.ne.s32.totalorder %s606_s3, %s815_s4  ;;  %p821_p2 = scmp.lt.s32.totalorder %s815_s4, %s815_s4 }
  0x18   :  { %799 = vmatpush3.bf16.msra.mxu0 %v796_v24  ;;  %807 = vmatpush3.bf16.msra.mxu1 %v796_v24 }
  0x19   :  { %p822_p3 = por %p821_p2, %p820_p1 }
  0x1a   :  { %113 = vperm.xlu1 %814, %v34_v25   ;;  %65 = vperm.xlu0 %813, %v18_v26  }
  0x1b   :  { %p823_p4 = pnand %p822_p3, %p816_p0 }
  0x1e   :  { %116 = vperm.xlu1 %814, %v35_v27   ;;  %68 = vperm.xlu0 %813, %v19_v28  }
  0x22   :  { %119 = vperm.xlu1 %814, %v36_v29   ;;  %71 = vperm.xlu0 %813, %v20_v30  }
  0x26   :  { %122 = vperm.xlu1 %814, %v37_v31   ;;  %74 = vperm.xlu0 %813, %v21_v32  }
  0x2a   :  { %125 = vperm.xlu1 %814, %v38_v33   ;;  %77 = vperm.xlu0 %813, %v22_v34  }
  0x2e   :  { %128 = vperm.xlu1 %814, %v39_v35   ;;  %80 = vperm.xlu0 %813, %v23_v36  }
  0x32   :  { %131 = vperm.xlu1 %814, %v40_v37   ;;  %83 = vperm.xlu0 %813, %v24_v38  }
  0x36   :  { %134 = vperm.xlu1 %814, %v41_v39   ;;  %86 = vperm.xlu0 %813, %v25_v40  }
  0x3a   :  { %137 = vperm.xlu1 %814, %v42_v41   ;;  %89 = vperm.xlu0 %813, %v26_v42  }
  0x3e   :  { %140 = vperm.xlu1 %814, %v43_v43   ;;  %92 = vperm.xlu0 %813, %v27_v44  }
  0x81   :  { %v51_v47 = vpop.permute.xlu1 %50  ;;  %v48_v48 = vpop.permute.xlu0 %47 }
  0x82   :  { %vm143_vm1 = vcmp.eq.s32.totalorder %v51_v47, %v979_v46  ;;  %vm142_vm2 = vcmp.eq.s32.totalorder %v48_v48, %v979_v46 }
  0x83   :  { %v617_v50 = vsel %vm143_vm1, 1.0, %v840_v49  ;;  %v616_v51 = vsel %vm142_vm2, 1.0, %v840_v49 }
  0x84   :  { %736 = vmatprep.mubr.msk.f32.mxu0 %vm246_vm0, %v616_v51 }
  0x85   :  { %v99_v52 = vpop.permute.xlu1 %98  ;;  %737 = vmatmul.mubr.msk.f32.vlgmr.msra.gmra.mrb[0].mxu0 %vm246_vm0, %v617_v50  ;;  %v96_v53 = vpop.permute.xlu0 %95 }
  0x86   :  { %vm159_vm3 = vcmp.eq.s32.totalorder %v99_v52, %v979_v46  ;;  %vm158_vm4 = vcmp.eq.s32.totalorder %v96_v53, %v979_v46 }
  0x87   :  { %v633_v54 = vsel %vm159_vm3, 1.0, %v840_v49  ;;  %v632_v55 = vsel %vm158_vm4, 1.0, %v840_v49 }
  0x88   :  { %760 = vmatprep.mubr.msk.f32.mxu1 %vm246_vm0, %v632_v55 }
  0x89   :  { %v102_v56 = vpop.permute.xlu1 %101  ;;  %761 = vmatmul.mubr.msk.f32.vlgmr.msra.gmra.mrb[0].mxu1 %vm246_vm0, %v633_v54  ;;  %v54_v57 = vpop.permute.xlu0 %53 }
  0x8a   :  { %vm160_vm5 = vcmp.eq.s32.totalorder %v102_v56, %v979_v46  ;;  %vm144_vm6 = vcmp.eq.s32.totalorder %v54_v57, %v979_v46 }
  0x8b   :  { %v634_v58 = vsel %vm160_vm5, 1.0, %v840_v49  ;;  %v618_v59 = vsel %vm144_vm6, 1.0, %v840_v49 }
  0x8c   :  { %739 = vmatprep.mubr.msk.f32.mxu0 %vm246_vm0, %v618_v59  ;;  %763 = vmatprep.mubr.msk.f32.mxu1 %vm246_vm0, %v634_v58 }
  0x8d   :  { %v105_v60 = vpop.permute.xlu1 %104  ;;  %v57_v61 = vpop.permute.xlu0 %56 }
  0x8e   :  { %vm161_vm7 = vcmp.eq.s32.totalorder %v105_v60, %v979_v46  ;;  %vm145_vm8 = vcmp.eq.s32.totalorder %v57_v61, %v979_v46 }
  0x8f   :  { %v635_v62 = vsel %vm161_vm7, 1.0, %v840_v49  ;;  %v619_v63 = vsel %vm145_vm8, 1.0, %v840_v49 }
  0x90   :  { %740 = vmatmul.mubr.msk.f32.gmra.mrb[2].mxu0 %vm246_vm0, %v619_v63  ;;  %764 = vmatmul.mubr.msk.f32.gmra.mrb[2].mxu1 %vm246_vm0, %v635_v62 }
  0x91   :  { %v108_v0 = vpop.permute.xlu1 %107  ;;  %v60_v1 = vpop.permute.xlu0 %59 }
  0x92   :  { %vm162_vm9 = vcmp.eq.s32.totalorder %v108_v0, %v979_v46  ;;  %vm146_vm10 = vcmp.eq.s32.totalorder %v60_v1, %v979_v46 }
  0x93   :  { %v636_v2 = vsel %vm162_vm9, 1.0, %v840_v49  ;;  %v620_v3 = vsel %vm146_vm10, 1.0, %v840_v49 }
  0x94   :  { %742 = vmatprep.mubr.msk.f32.mxu0 %vm246_vm0, %v620_v3  ;;  %766 = vmatprep.mubr.msk.f32.mxu1 %vm246_vm0, %v636_v2 }
  0x95   :  { %v111_v4 = vpop.permute.xlu1 %110  ;;  %v63_v5 = vpop.permute.xlu0 %62 }
  0x96   :  { %vm163_vm11 = vcmp.eq.s32.totalorder %v111_v4, %v979_v46  ;;  %vm147_vm12 = vcmp.eq.s32.totalorder %v63_v5, %v979_v46 }
  0x97   :  { %v637_v6 = vsel %vm163_vm11, 1.0, %v840_v49  ;;  %v621_v7 = vsel %vm147_vm12, 1.0, %v840_v49 }
  0x98   :  { %743 = vmatmul.mubr.msk.f32.gmra.mrb[4].mxu0 %vm246_vm0, %v621_v7  ;;  %767 = vmatmul.mubr.msk.f32.gmra.mrb[4].mxu1 %vm246_vm0, %v637_v6 }
  0x99   :  { %v114_v8 = vpop.permute.xlu1 %113  ;;  %v66_v9 = vpop.permute.xlu0 %65 }
  0x9a   :  { %vm164_vm13 = vcmp.eq.s32.totalorder %v114_v8, %v979_v46  ;;  %vm148_vm14 = vcmp.eq.s32.totalorder %v66_v9, %v979_v46 }
  0x9b   :  { %v638_v10 = vsel %vm164_vm13, 1.0, %v840_v49  ;;  %v622_v11 = vsel %vm148_vm14, 1.0, %v840_v49 }
  0x9c   :  { %745 = vmatprep.mubr.msk.f32.mxu0 %vm246_vm0, %v622_v11  ;;  %769 = vmatprep.mubr.msk.f32.mxu1 %vm246_vm0, %v638_v10 }
  0x9d   :  { %v117_v12 = vpop.permute.xlu1 %116  ;;  %v69_v13 = vpop.permute.xlu0 %68 }
  0x9e   :  { %vm165_vm15 = vcmp.eq.s32.totalorder %v117_v12, %v979_v46  ;;  %vm149_vm1 = vcmp.eq.s32.totalorder %v69_v13, %v979_v46 }
  0x9f   :  { %v639_v14 = vsel %vm165_vm15, 1.0, %v840_v49  ;;  %v623_v15 = vsel %vm149_vm1, 1.0, %v840_v49 }
  0xa0   :  { %746 = vmatmul.mubr.msk.f32.gmra.mrb[6].mxu0 %vm246_vm0, %v623_v15  ;;  %770 = vmatmul.mubr.msk.f32.gmra.mrb[6].mxu1 %vm246_vm0, %v639_v14 }
  0xa1   :  { %v120_v16 = vpop.permute.xlu1 %119  ;;  %v72_v17 = vpop.permute.xlu0 %71 }
  0xa2   :  { %vm166_vm2 = vcmp.eq.s32.totalorder %v120_v16, %v979_v46  ;;  %vm150_vm3 = vcmp.eq.s32.totalorder %v72_v17, %v979_v46 }
  0xa3   :  { %v640_v18 = vsel %vm166_vm2, 1.0, %v840_v49  ;;  %v624_v19 = vsel %vm150_vm3, 1.0, %v840_v49 }
  0xa4   :  { %748 = vmatprep.mubr.msk.f32.mxu0 %vm246_vm0, %v624_v19  ;;  %772 = vmatprep.mubr.msk.f32.mxu1 %vm246_vm0, %v640_v18 }
  0xa5   :  { %v123_v20 = vpop.permute.xlu1 %122  ;;  %v75_v21 = vpop.permute.xlu0 %74 }
  0xa6   :  { %vm167_vm4 = vcmp.eq.s32.totalorder %v123_v20, %v979_v46  ;;  %vm151_vm5 = vcmp.eq.s32.totalorder %v75_v21, %v979_v46 }
  0xa7   :  { %v641_v22 = vsel %vm167_vm4, 1.0, %v840_v49  ;;  %v625_v23 = vsel %vm151_vm5, 1.0, %v840_v49 }
  0xa8   :  { %749 = vmatmul.mubr.msk.f32.gmra.mrb[8].mxu0 %vm246_vm0, %v625_v23  ;;  %773 = vmatmul.mubr.msk.f32.gmra.mrb[8].mxu1 %vm246_vm0, %v641_v22 }
  0xa9   :  { %v126_v24 = vpop.permute.xlu1 %125  ;;  %v78_v25 = vpop.permute.xlu0 %77 }
  0xaa   :  { %vm168_vm6 = vcmp.eq.s32.totalorder %v126_v24, %v979_v46  ;;  %vm152_vm7 = vcmp.eq.s32.totalorder %v78_v25, %v979_v46 }
  0xab   :  { %v642_v26 = vsel %vm168_vm6, 1.0, %v840_v49  ;;  %v626_v27 = vsel %vm152_vm7, 1.0, %v840_v49 }
  0xac   :  { %751 = vmatprep.mubr.msk.f32.mxu0 %vm246_vm0, %v626_v27  ;;  %775 = vmatprep.mubr.msk.f32.mxu1 %vm246_vm0, %v642_v26 }
  0xad   :  { %v129_v28 = vpop.permute.xlu1 %128  ;;  %v81_v29 = vpop.permute.xlu0 %80 }
  0xae   :  { %vm169_vm8 = vcmp.eq.s32.totalorder %v129_v28, %v979_v46  ;;  %vm153_vm9 = vcmp.eq.s32.totalorder %v81_v29, %v979_v46 }
  0xaf   :  { %v643_v30 = vsel %vm169_vm8, 1.0, %v840_v49  ;;  %v627_v31 = vsel %vm153_vm9, 1.0, %v840_v49 }
  0xb0   :  { %752 = vmatmul.mubr.msk.f32.gmra.mrb[10].mxu0 %vm246_vm0, %v627_v31  ;;  %776 = vmatmul.mubr.msk.f32.gmra.mrb[10].mxu1 %vm246_vm0, %v643_v30 }
  0xb1   :  { %v132_v32 = vpop.permute.xlu1 %131  ;;  %v84_v33 = vpop.permute.xlu0 %83 }
  0xb2   :  { %vm170_vm10 = vcmp.eq.s32.totalorder %v132_v32, %v979_v46  ;;  %vm154_vm11 = vcmp.eq.s32.totalorder %v84_v33, %v979_v46 }
  0xb3   :  { %v644_v34 = vsel %vm170_vm10, 1.0, %v840_v49  ;;  %v628_v35 = vsel %vm154_vm11, 1.0, %v840_v49 }
  0xb4   :  { %754 = vmatprep.mubr.msk.f32.mxu0 %vm246_vm0, %v628_v35  ;;  %778 = vmatprep.mubr.msk.f32.mxu1 %vm246_vm0, %v644_v34 }
  0xb5   :  { %v135_v36 = vpop.permute.xlu1 %134  ;;  %v87_v37 = vpop.permute.xlu0 %86 }
  0xb6   :  { %vm171_vm12 = vcmp.eq.s32.totalorder %v135_v36, %v979_v46  ;;  %vm155_vm13 = vcmp.eq.s32.totalorder %v87_v37, %v979_v46 }
  0xb7   :  { %v645_v38 = vsel %vm171_vm12, 1.0, %v840_v49  ;;  %v629_v39 = vsel %vm155_vm13, 1.0, %v840_v49 }
  0xb8   :  { %755 = vmatmul.mubr.msk.f32.gmra.mrb[12].mxu0 %vm246_vm0, %v629_v39  ;;  %779 = vmatmul.mubr.msk.f32.gmra.mrb[12].mxu1 %vm246_vm0, %v645_v38 }
  0xb9   :  { %v138_v40 = vpop.permute.xlu1 %137  ;;  %v90_v41 = vpop.permute.xlu0 %89 }
  0xba   :  { %vm172_vm14 = vcmp.eq.s32.totalorder %v138_v40, %v979_v46  ;;  %vm156_vm15 = vcmp.eq.s32.totalorder %v90_v41, %v979_v46 }
  0xbb   :  { %v646_v42 = vsel %vm172_vm14, 1.0, %v840_v49  ;;  %v630_v43 = vsel %vm156_vm15, 1.0, %v840_v49 }
  0xbc   :  { %757 = vmatprep.mubr.msk.f32.mxu0 %vm246_vm0, %v630_v43  ;;  %781 = vmatprep.mubr.msk.f32.mxu1 %vm246_vm0, %v646_v42 }
  0xbd   :  { %v141_v44 = vpop.permute.xlu1 %140  ;;  %v93_v45 = vpop.permute.xlu0 %92 }
  0xbe   :  { %vm173_vm1 = vcmp.eq.s32.totalorder %v141_v44, %v979_v46  ;;  %vm157_vm2 = vcmp.eq.s32.totalorder %v93_v45, %v979_v46 }
  0xbf   :  { %v647_v47 = vsel %vm173_vm1, 1.0, %v840_v49  ;;  %v631_v48 = vsel %vm157_vm2, 1.0, %v840_v49 }
  0xc0   :  { %758 = vmatmul.mubr.msk.f32.gmra.mrb[14].mxu0 %vm246_vm0, %v631_v48  ;;  %782 = vmatmul.mubr.msk.f32.gmra.mrb[14].mxu1 %vm246_vm0, %v647_v47 }
 0x158   :  { %v738_v50 = vpop.f32.mrb[0].mxu0 }
 0x159   :  { %569 = vst [vmem:[#allocation2 + $0x8] sm:$0xff] %v738_v50  ;;  %v409_v51 = vpop.f32.mrb[1].mxu0 }
 0x15a   :  { %568 = vst [vmem:[#allocation2] sm:$0xff] %v409_v51 }
 0x15c   :  { %v762_v52 = vpop.f32.mrb[0].mxu1 }
 0x15d   :  { %585 = vst [vmem:[#allocation2 + $0x88] sm:$0xff] %v762_v52  ;;  %v489_v53 = vpop.f32.mrb[1].mxu1 }
 0x15e   :  { %584 = vst [vmem:[#allocation2 + $0x80] sm:$0xff] %v489_v53 }
 0x163   :  { %v741_v54 = vpop.f32.mrb[2].mxu0  ;;  %v765_v55 = vpop.f32.mrb[2].mxu1 }
 0x164   :  { %571 = vst [vmem:[#allocation2 + $0x18] sm:$0xff] %v741_v54  ;;  %587 = vst [vmem:[#allocation2 + $0x98] sm:$0xff] %v765_v55  ;;  %v419_v46 = vpop.f32.mrb[3].mxu0  ;;  %v499_v56 = vpop.f32.mrb[3].mxu1 }
 0x165   :  { %570 = vst [vmem:[#allocation2 + $0x10] sm:$0xff] %v419_v46  ;;  %586 = vst [vmem:[#allocation2 + $0x90] sm:$0xff] %v499_v56 }
 0x16b   :  { %v744_v49 = vpop.f32.mrb[4].mxu0  ;;  %v768_v57 = vpop.f32.mrb[4].mxu1 }
 0x16c   :  { %573 = vst [vmem:[#allocation2 + $0x28] sm:$0xff] %v744_v49  ;;  %589 = vst [vmem:[#allocation2 + $0xa8] sm:$0xff] %v768_v57  ;;  %v429_v58 = vpop.f32.mrb[5].mxu0  ;;  %v509_v59 = vpop.f32.mrb[5].mxu1 }
 0x16d   :  { %572 = vst [vmem:[#allocation2 + $0x20] sm:$0xff] %v429_v58  ;;  %588 = vst [vmem:[#allocation2 + $0xa0] sm:$0xff] %v509_v59 }
 0x173   :  { %v747_v60 = vpop.f32.mrb[6].mxu0  ;;  %v771_v61 = vpop.f32.mrb[6].mxu1 }
 0x174   :  { %575 = vst [vmem:[#allocation2 + $0x38] sm:$0xff] %v747_v60  ;;  %591 = vst [vmem:[#allocation2 + $0xb8] sm:$0xff] %v771_v61  ;;  %v439_v62 = vpop.f32.mrb[7].mxu0  ;;  %v519_v63 = vpop.f32.mrb[7].mxu1 }
 0x175   :  { %574 = vst [vmem:[#allocation2 + $0x30] sm:$0xff] %v439_v62  ;;  %590 = vst [vmem:[#allocation2 + $0xb0] sm:$0xff] %v519_v63 }
 0x17b   :  { %v750_v0 = vpop.f32.mrb[8].mxu0  ;;  %v774_v1 = vpop.f32.mrb[8].mxu1 }
 0x17c   :  { %577 = vst [vmem:[#allocation2 + $0x48] sm:$0xff] %v750_v0  ;;  %593 = vst [vmem:[#allocation2 + $0xc8] sm:$0xff] %v774_v1  ;;  %v449_v2 = vpop.f32.mrb[9].mxu0  ;;  %v529_v3 = vpop.f32.mrb[9].mxu1 }
 0x17d   :  { %576 = vst [vmem:[#allocation2 + $0x40] sm:$0xff] %v449_v2  ;;  %592 = vst [vmem:[#allocation2 + $0xc0] sm:$0xff] %v529_v3 }
 0x183   :  { %v753_v4 = vpop.f32.mrb[10].mxu0  ;;  %v777_v5 = vpop.f32.mrb[10].mxu1 }
 0x184   :  { %579 = vst [vmem:[#allocation2 + $0x58] sm:$0xff] %v753_v4  ;;  %595 = vst [vmem:[#allocation2 + $0xd8] sm:$0xff] %v777_v5  ;;  %v459_v6 = vpop.f32.mrb[11].mxu0  ;;  %v539_v7 = vpop.f32.mrb[11].mxu1 }
 0x185   :  { %578 = vst [vmem:[#allocation2 + $0x50] sm:$0xff] %v459_v6  ;;  %594 = vst [vmem:[#allocation2 + $0xd0] sm:$0xff] %v539_v7 }
 0x18b   :  { %v756_v8 = vpop.f32.mrb[12].mxu0  ;;  %v780_v9 = vpop.f32.mrb[12].mxu1 }
 0x18c   :  { %581 = vst [vmem:[#allocation2 + $0x68] sm:$0xff] %v756_v8  ;;  %597 = vst [vmem:[#allocation2 + $0xe8] sm:$0xff] %v780_v9  ;;  %v469_v10 = vpop.f32.mrb[13].mxu0  ;;  %v549_v11 = vpop.f32.mrb[13].mxu1 }
 0x18d   :  { %580 = vst [vmem:[#allocation2 + $0x60] sm:$0xff] %v469_v10  ;;  %596 = vst [vmem:[#allocation2 + $0xe0] sm:$0xff] %v549_v11 }
 0x193   :  { %v759_v12 = vpop.f32.mrb[14].mxu0  ;;  %v783_v13 = vpop.f32.mrb[14].mxu1 }
 0x194   :  { %583 = vst [vmem:[#allocation2 + $0x78] sm:$0xff] %v759_v12  ;;  %599 = vst [vmem:[#allocation2 + $0xf8] sm:$0xff] %v783_v13  ;;  %v479_v14 = vpop.f32.mrb[15].mxu0  ;;  %v559_v15 = vpop.f32.mrb[15].mxu1 }
 0x195   :  { %582 = vst [vmem:[#allocation2 + $0x70] sm:$0xff] %v479_v14  ;;  %598 = vst [vmem:[#allocation2 + $0xf0] sm:$0xff] %v559_v15 }
 0x196   :  { %826 = shalt.err (!%p823_p4)
}
 0x197   :  { %s827_s7 = scalar_lea.hbm %s1091_s2, 4096 }
 0x198   :  { %p828_p5 = scmp.ne.s32.totalorder %s1091_s2, %s827_s7  ;;  %p831_p6 = scmp.lt.u32.totalorder %s827_s7, %s1091_s2 }
 0x19a   :  { %p833_p7 = pnand %p831_p6, %p828_p5 }
 0x19c   :  { %836 = shalt.err (!%p833_p7)
}
 0x19d   :  { %s842_s12 = smov 128   ;;  %s843_s13 = smov 8  }
 0x19e   :  { %611 = dma.vmem_to_hbm [thread:$0]  %s606_s3, 4096, %s1091_s2, [#allocation3], %s842_s12, %s842_s12, %s843_s13  }
 0x19f   :  { %837 = dma.done.wait [#allocation3], 4096  }
 0x1a0   :  { %838 = vsyncadd [#allocation3], 4294963200 }
 0x1a1   :  { %615 = vsyncpa [#allocation3], 1 }

</bundles_post_ra>
